<compile_context>
chip_gen: v5e
topology: v5e:2x2
jax: 0.10.0
libtpu: 0.0.40
codegen_flags: <defaults>
</compile_context>

<pallas_src>
import functools
import math

import jax
import jax.numpy as jnp
from jax.experimental import pallas as pl
from jax.experimental.pallas import tpu as pltpu


def _round_up(x, m):
    return (x + m - 1) // m * m


# -----------------------------------------------------------------------------
# Kernel
# -----------------------------------------------------------------------------
def _qnetwork_kernel(xu_ref, slab_ref, qt_ref, *, offs, dims):
    in_dim, H = dims
    H2 = 2 * H
    w1_off, w2_off, w3_off, b_off = offs

    x = xu_ref[...]                                             # (tm, in_dim)

    # Layer 1 (both heads fused): one (tm, in_dim) @ (in_dim, 2H) matmul.
    h = jnp.dot(x, slab_ref[w1_off:w1_off + in_dim, :],
                preferred_element_type=jnp.float32)
    h = jnp.maximum(h + slab_ref[b_off:b_off + 1, :], 0.0)

    # Layer 2: block-diagonal [w2 0; 0 w5] keeps the two heads independent.
    h = jnp.dot(h, slab_ref[w2_off:w2_off + H2, :],
                preferred_element_type=jnp.float32)
    h = jnp.maximum(h + slab_ref[b_off + 1:b_off + 2, :], 0.0)

    # Layer 3 at full 64-lane width (cols 2..63 of W3 rows / bias row are zero),
    # so no lane-narrow slices; col 0 = q1, col 1 = q2.
    q = jnp.dot(h, slab_ref[w3_off:w3_off + H2, :],
                preferred_element_type=jnp.float32)
    q = q + slab_ref[b_off + 2:b_off + 3, :]

    # Lane-dense transposed store: (tm, 64) -> (64, tm) on the XLU, keep rows 0..1.
    qt_ref[...] = jnp.transpose(q)[:2, :].astype(qt_ref.dtype)


# -----------------------------------------------------------------------------
# Parameter packing (done once, outside the hot path)
# -----------------------------------------------------------------------------
def pack_qnetwork_params(params, in_dim, hidden_dim):
    """Packs all 6 weights + 6 biases into one f32 slab with 8-aligned row offsets."""
    H = hidden_dim
    H2 = 2 * H

    w1_off = 0
    w2_off = _round_up(in_dim, 8)
    w3_off = _round_up(w2_off + H2, 8)
    b_off = _round_up(w3_off + H2, 8)
    rows = _round_up(b_off + 3, 8)

    slab = jnp.zeros((rows, H2), dtype=jnp.float32)

    # Layer 1: [w1 | w4], contiguous over the full in_dim rows (concat folded away).
    slab = slab.at[w1_off:w1_off + in_dim, 0:H].set(params["w1"])
    slab = slab.at[w1_off:w1_off + in_dim, H:H2].set(params["w4"])

    # Layer 2: block-diagonal [w2 0; 0 w5].
    slab = slab.at[w2_off:w2_off + H, 0:H].set(params["w2"])
    slab = slab.at[w2_off + H:w2_off + H2, H:H2].set(params["w5"])

    # Layer 3: w3 in column 0, w6 in column 1; remaining columns stay zero.
    slab = slab.at[w3_off:w3_off + H, 0:1].set(params["w3"])
    slab = slab.at[w3_off + H:w3_off + H2, 1:2].set(params["w6"])

    # Biases: rows b_off .. b_off+2 hold [b1|b4], [b2|b5], [b3, b6, 0...].
    slab = slab.at[b_off, 0:H].set(params["b1"][0])
    slab = slab.at[b_off, H:H2].set(params["b4"][0])
    slab = slab.at[b_off + 1, 0:H].set(params["b2"][0])
    slab = slab.at[b_off + 1, H:H2].set(params["b5"][0])
    slab = slab.at[b_off + 2, 0].set(params["b3"][0, 0])
    slab = slab.at[b_off + 2, 1].set(params["b6"][0, 0])

    offs = (w1_off, w2_off, w3_off, b_off)
    dims = (in_dim, hidden_dim)
    return slab, offs, dims


# -----------------------------------------------------------------------------
# Wrapper
# -----------------------------------------------------------------------------
def qnetwork_apply(state, action, packed):
    """Twin-Q forward pass in a single Pallas call.

    Returns the lane-dense slab qt of shape (2, B): row 0 = q1, row 1 = q2.
    """
    slab, offs, dims = packed
    in_dim, _ = dims
    B = state.shape[0]

    xu = jnp.concatenate([state, action], axis=1)        # (B, in_dim)

    # Batch tiling: tiles up to 512 rows (multiple of 128 so multi-tile transposed
    # output blocks stay (8,128)-legal); "parallel" so large batches shard across
    # TensorCores. For B=8 this collapses to grid=(1,). No input padding: Pallas
    # handles the ragged last block, garbage rows are dropped by the [:, :B] slice.
    # TODO(synk): on v7x (2 TCs) force n_tiles >= 2 for 256 < B <= 1024 to use both cores.
    tm = min(_round_up(B, 8), 512)
    n_tiles = pl.cdiv(B, tm)
    Bp = n_tiles * tm

    kernel = functools.partial(_qnetwork_kernel, offs=offs, dims=dims)

    qt = pl.pallas_call(
        kernel,
        out_shape=jax.ShapeDtypeStruct((2, Bp), jnp.float32),
        grid=(n_tiles,),
        in_specs=[
            pl.BlockSpec((tm, in_dim), lambda i: (i, 0)),
            pl.BlockSpec(slab.shape, lambda i: (0, 0)),   # weights resident across tiles
        ],
        out_specs=pl.BlockSpec((2, tm), lambda i: (0, i)),
        compiler_params=pltpu.CompilerParams(
            dimension_semantics=("parallel",),
            # Footprint < 1 MiB even at tm=512; well inside every generation's VMEM.
            vmem_limit_bytes=32 << 20,
        ),
    )(xu, slab)

    return qt[:, :B]


def qnetwork_forward(state, action, packed):
    """Module-compatible interface: returns (q1, q2), each (B, 1)."""
    qt = qnetwork_apply(state, action, packed)
    return qt[0, :, None], qt[1, :, None]


# -----------------------------------------------------------------------------
# Init (matches torch xavier_uniform_ + zero bias); weights stored (in, out)
# -----------------------------------------------------------------------------
def _xavier_uniform(key, fan_in, fan_out, dtype=jnp.float32):
    limit = math.sqrt(6.0 / (fan_in + fan_out))
    return jax.random.uniform(key, (fan_in, fan_out), dtype=dtype,
                              minval=-limit, maxval=limit)


def init_qnetwork_params(key, in_dim, hidden_dim):
    keys = jax.random.split(key, 6)
    dims = [
        (in_dim, hidden_dim),      # linear1
        (hidden_dim, hidden_dim),  # linear2
        (hidden_dim, 1),           # linear3
        (in_dim, hidden_dim),      # linear4
        (hidden_dim, hidden_dim),  # linear5
        (hidden_dim, 1),           # linear6
    ]
    params = {}
    for i, (k, (fi, fo)) in enumerate(zip(keys, dims), start=1):
        params[f"w{i}"] = _xavier_uniform(k, fi, fo)
        params[f"b{i}"] = jnp.zeros((1, fo), dtype=jnp.float32)
    # TODO(synk): sparsity masks (sp.initialize_mask) are runtime-config dependent;
    #             dense layers are used here (global_sparsity == 0 case).
    return params


if __name__ == "__main__":
    # state_dim = 24, num_fake_features = 0 -> dim_state_with_fake = 24
    # action_dim = 8, hidden_dim (num_hid_neurons) = 32, batch = 8
    batch = 8
    state_dim = 24
    action_dim = 8
    hidden_dim = 32
    in_dim = state_dim + action_dim

    root = jax.random.PRNGKey(0)
    k_state, k_action, k_params = jax.random.split(root, 3)

    state = jax.random.normal(k_state, (batch, state_dim), dtype=jnp.float32)
    action = jax.random.normal(k_action, (batch, action_dim), dtype=jnp.float32)
    params = init_qnetwork_params(k_params, in_dim, hidden_dim)

    packed = pack_qnetwork_params(params, in_dim, hidden_dim)
    q1, q2 = qnetwork_forward(state, action, packed)
    jax.block_until_ready((q1, q2))

    # Cross-check against a plain-JAX reference of the original (unfused) math.
    xu = jnp.concatenate([state, action], axis=1)

    def head(x, w_a, b_a, w_b, b_b, w_c, b_c):
        h = jnp.maximum(x @ w_a + b_a, 0.0)
        h = jnp.maximum(h @ w_b + b_b, 0.0)
        return h @ w_c + b_c

    q1_ref = head(xu, params["w1"], params["b1"], params["w2"], params["b2"],
                  params["w3"], params["b3"])
    q2_ref = head(xu, params["w4"], params["b4"], params["w5"], params["b5"],
                  params["w6"], params["b6"])
    assert q1.shape == (batch, 1) and q2.shape == (batch, 1)
    assert jnp.allclose(q1, q1_ref, atol=1e-5, rtol=1e-5)
    assert jnp.allclose(q2, q2_ref, atol=1e-5, rtol=1e-5)

    print("KERNEL_OK")
</pallas_src>

<mosaic_0001>
module attributes {stable_mosaic.version = 11 : i64} {
  func.func @_qnetwork_kernel(%arg0: i32, %arg1: memref<8x32xf32, #tpu.memory_space<vmem>>, %arg2: memref<168x64xf32, #tpu.memory_space<vmem>>, %arg3: memref<2x8xf32, #tpu.memory_space<vmem>>) attributes {dimension_semantics = [#tpu.dimension_semantics<parallel>], iteration_bounds = array<i64: 1>, scalar_prefetch = 0 : i64, scratch_operands = 0 : i64, tpu.core_type = #tpu.core_type<tc>, window_params = [{transform_indices = @transform_0, window_bounds = array<i64: 8, 32>}, {pipeline_mode = #tpu.pipeline_mode<synchronous>, transform_indices = @transform_1, window_bounds = array<i64: 168, 64>}, {transform_indices = @transform_2, window_bounds = array<i64: 2, 8>}]} {
    %c0 = arith.constant 0 : index
    %c0_0 = arith.constant 0 : index
    %0 = vector.load %arg1[%c0, %c0_0] : memref<8x32xf32, #tpu.memory_space<vmem>>, vector<8x32xf32>
    %c0_1 = arith.constant 0 : index
    %c0_2 = arith.constant 0 : index
    %1 = vector.load %arg2[%c0_1, %c0_2] : memref<168x64xf32, #tpu.memory_space<vmem>>, vector<32x64xf32>
    %cst = arith.constant dense<0.000000e+00> : vector<8x64xf32>
    %2 = tpu.matmul %0, %1, %cst {dimension_numbers = #tpu.dot_dimension_numbers<[1], [0], [0], [1], [0, 0, 1, 1], [], []>} : vector<8x32xf32>, vector<32x64xf32>, vector<8x64xf32> -> vector<8x64xf32>
    %c160 = arith.constant 160 : index
    %c0_3 = arith.constant 0 : index
    %3 = vector.load %arg2[%c160, %c0_3] : memref<168x64xf32, #tpu.memory_space<vmem>>, vector<1x64xf32>
    %4 = vector.broadcast %3 : vector<1x64xf32> to vector<8x64xf32>
    %5 = arith.addf %2, %4 : vector<8x64xf32>
    %cst_4 = arith.constant 0.000000e+00 : f32
    %6 = vector.broadcast %cst_4 : f32 to vector<8x64xf32>
    %7 = arith.maximumf %5, %6 : vector<8x64xf32>
    %c32 = arith.constant 32 : index
    %c0_5 = arith.constant 0 : index
    %8 = vector.load %arg2[%c32, %c0_5] : memref<168x64xf32, #tpu.memory_space<vmem>>, vector<64x64xf32>
    %cst_6 = arith.constant dense<0.000000e+00> : vector<8x64xf32>
    %9 = tpu.matmul %7, %8, %cst_6 {dimension_numbers = #tpu.dot_dimension_numbers<[1], [0], [0], [1], [0, 0, 1, 1], [], []>} : vector<8x64xf32>, vector<64x64xf32>, vector<8x64xf32> -> vector<8x64xf32>
    %c161 = arith.constant 161 : index
    %c0_7 = arith.constant 0 : index
    %10 = vector.load %arg2[%c161, %c0_7] : memref<168x64xf32, #tpu.memory_space<vmem>>, vector<1x64xf32>
    %11 = vector.broadcast %10 : vector<1x64xf32> to vector<8x64xf32>
    %12 = arith.addf %9, %11 : vector<8x64xf32>
    %cst_8 = arith.constant 0.000000e+00 : f32
    %13 = vector.broadcast %cst_8 : f32 to vector<8x64xf32>
    %14 = arith.maximumf %12, %13 : vector<8x64xf32>
    %c96 = arith.constant 96 : index
    %c0_9 = arith.constant 0 : index
    %15 = vector.load %arg2[%c96, %c0_9] : memref<168x64xf32, #tpu.memory_space<vmem>>, vector<64x64xf32>
    %cst_10 = arith.constant dense<0.000000e+00> : vector<8x64xf32>
    %16 = tpu.matmul %14, %15, %cst_10 {dimension_numbers = #tpu.dot_dimension_numbers<[1], [0], [0], [1], [0, 0, 1, 1], [], []>} : vector<8x64xf32>, vector<64x64xf32>, vector<8x64xf32> -> vector<8x64xf32>
    %c162 = arith.constant 162 : index
    %c0_11 = arith.constant 0 : index
    %17 = vector.load %arg2[%c162, %c0_11] : memref<168x64xf32, #tpu.memory_space<vmem>>, vector<1x64xf32>
    %18 = vector.broadcast %17 : vector<1x64xf32> to vector<8x64xf32>
    %19 = arith.addf %16, %18 : vector<8x64xf32>
    %20 = tpu.transpose %19, [1, 0] : vector<8x64xf32> -> vector<64x8xf32>
    %21 = vector.extract_strided_slice %20 {offsets = [0, 0], sizes = [2, 8], strides = [1, 1]} : vector<64x8xf32> to vector<2x8xf32>
    %c0_12 = arith.constant 0 : index
    %c0_13 = arith.constant 0 : index
    %22 = vector.load %arg3[%c0_12, %c0_13] : memref<2x8xf32, #tpu.memory_space<vmem>>, vector<2x8xf32>
    tpu.vector_store %arg3[%c0_12, %c0_13], %21 {strides = array<i32>} : memref<2x8xf32, #tpu.memory_space<vmem>>, vector<2x8xf32>,
    return
  }
  func.func @transform_0(%arg0: i32) -> (i32, i32) {
    %c0_i32 = arith.constant 0 : i32
    %c0_i32_0 = arith.constant 0 : i32
    return %arg0, %c0_i32 : i32, i32
  }
  func.func @transform_1(%arg0: i32) -> (i32, i32) {
    %c0_i32 = arith.constant 0 : i32
    %c0_i32_0 = arith.constant 0 : i32
    %c0_i32_1 = arith.constant 0 : i32
    return %c0_i32, %c0_i32_0 : i32, i32
  }
  func.func @transform_2(%arg0: i32) -> (i32, i32) {
    %c0_i32 = arith.constant 0 : i32
    %c0_i32_0 = arith.constant 0 : i32
    return %c0_i32, %arg0 : i32, i32
  }
}

</mosaic_0001>

<bundles_post_ra>
// kernel: tpu_custom_call.1
= control target key start
LH: loop header
LB: loop body
LE: loop exit
PB: predicated region body
PF: predicated region fallthrough
CT: control target
= control target key end

     0   :  { %s287_s0 = inlined_call_operand.vmem [shape: f32[8,32], index: 0, kind: input, shape index: {}]   ;;  %s288_s1 = inlined_call_operand.vmem [shape: f32[168,64], index: 1, kind: input, shape index: {}]   ;;  %s289_s2 = inlined_call_operand.hbm [shape: f32[2,8], index: 2, kind: output, shape index: {}]  }
   0x1   :  { %v16_v0 = vld [vmem:[%s288_s1 + $0x18] sm:$0xff]  ;;  %v15_v1 = vld [vmem:[%s288_s1 + $0x10] sm:$0xff]  ;;  %v14_v3 = vld [vmem:[%s288_s1 + $0x8] sm:$0xff] }
   0x2   :  { %35 = vmatpush.msra.mxu0 %v16_v0  ;;  %v51_v2 = vld [vmem:[%s288_s1 + $0x58] sm:$0xff]  ;;  %v50_v4 = vld [vmem:[%s288_s1 + $0x50] sm:$0xff]  ;;  %v13_v5 = vld [vmem:[%s288_s1] sm:$0xff] }
   0x3   :  { %66 = vmatpush.msra.mxu1 %v51_v2  ;;  %v49_v6 = vld [vmem:[%s288_s1 + $0x48] sm:$0xff] }
   0x4   :  { %36 = vmatpush.msra.mxu0 %v15_v1 }
   0x5   :  { %67 = vmatpush.msra.mxu1 %v50_v4 }
   0x6   :  { %7 = vsyncpa [#allocation3], 0  ;;  %37 = vmatpush.msra.mxu0 %v14_v3  ;;  %v12_v7 = vld [vmem:[%s287_s0] sm:$0xff]  ;;  %vm19_vm0 = vcmask 261120   ;;  %v47_v9 = vld [vmem:[%s288_s1 + $0x38] sm:$0xff]  ;;  %vm54_vm1 = vcmask 523264  }
   0x7   :  { %v48_v8 = vld [vmem:[%s288_s1 + $0x40] sm:$0xff]  ;;  %68 = vmatpush.msra.mxu1 %v49_v6  ;;  %v46_v10 = vld [vmem:[%s288_s1 + $0x30] sm:$0xff]  ;;  %v45_v11 = vld [vmem:[%s288_s1 + $0x28] sm:$0xff]  ;;  %s196_s28 = smov [#allocation2]   ;;  %s153_s3 = sshll.u32 %s289_s2, 4  ;;  %vm144_vm2 = vcmask 58368   ;;  %s154_s3 = int_to_ptr.hbm [resolvable:$true] %s153_s3 }
   0x8   :  { %38 = vmatpush.msra.mxu0 %v13_v5  ;;  %v44_v12 = vld [vmem:[%s288_s1 + $0x20] sm:$0xff]  ;;  %v86_v13 = vld [vmem:[%s288_s1 + $0x98] sm:$0xff]  ;;  %v85_v14 = vld [vmem:[%s288_s1 + $0x90] sm:$0xff]  ;;  %s151_s29 = sshll.u32 %s196_s28, 4  ;;  %s152_s29 = int_to_ptr.vmem [resolvable:$true] %s151_s29 }
   0x9   :  { %162 = vmatmul.msk.f32.vlgmr.msra.gmra.mxu0 %vm19_vm0, %v12_v7  ;;  %69 = vmatpush.msra.mxu1 %v48_v8  ;;  %v84_v15 = vld [vmem:[%s288_s1 + $0x88] sm:$0xff]  ;;  %v83_v16 = vld [vmem:[%s288_s1 + $0x80] sm:$0xff]  ;;  %v82_v17 = vld [vmem:[%s288_s1 + $0x78] sm:$0xff] }
   0xa   :  { %100 = vmatpush.msra.mxu2 %v86_v13  ;;  %v167_v18 = vld [vmem:[%s288_s1 + $0xa0] ss:$0 sm:$0xff]  ;;  %v81_v22 = vld [vmem:[%s288_s1 + $0x70] sm:$0xff]  ;;  %v80_v23 = vld [vmem:[%s288_s1 + $0x68] sm:$0xff] }
   0xb   :  { %70 = vmatpush.msra.mxu1 %v47_v9  ;;  %v79_v24 = vld [vmem:[%s288_s1 + $0x60] sm:$0xff] }
   0xc   :  { %101 = vmatpush.msra.mxu2 %v85_v14  ;;  %v168_v25 = vld [vmem:[%s288_s1 + $0xa1] ss:$0 sm:$0xff]  ;;  %v169_v29 = vld [vmem:[%s288_s1 + $0xa2] ss:$0 sm:$0xff] }
   0xd   :  { %71 = vmatpush.msra.mxu1 %v46_v10 }
   0xe   :  { %102 = vmatpush.msra.mxu2 %v84_v15 }
   0xf   :  { %72 = vmatpush.msra.mxu1 %v45_v11 }
  0x10   :  { %103 = vmatpush.msra.mxu2 %v83_v16 }
  0x11   :  { %73 = vmatpush.msra.mxu1 %v44_v12 }
  0x12   :  { %104 = vmatpush.msra.mxu2 %v82_v17 }
  0x14   :  { %105 = vmatpush.msra.mxu2 %v81_v22 }
  0x16   :  { %106 = vmatpush.msra.mxu2 %v80_v23 }
  0x18   :  { %107 = vmatpush.msra.mxu2 %v79_v24 }
  0x86   :  { %v40_v19 = vpop.f32.mrf.mxu0 }
  0x87   :  { %v41_v20 = vadd.f32 %v167_v18, %v40_v19 }
  0x89   :  { %v43_v21 = vmax.f32 %v41_v20, 0.0 }
  0x8b   :  { %163 = vmatmul.msk.f32.vlgmr.msra.gmra.mxu1 %vm54_vm1, %v43_v21 }
 0x108   :  { %v75_v26 = vpop.f32.mrf.mxu1 }
 0x109   :  { %v76_v27 = vadd.f32 %v168_v25, %v75_v26 }
 0x10b   :  { %v78_v28 = vmax.f32 %v76_v27, 0.0 }
 0x10d   :  { %164 = vmatmul.msk.f32.vlgmr.msra.gmra.mxu2 %vm54_vm1, %v78_v28 }
 0x190   :  { %v109_v30 = vpop.f32.mrf.mxu2 }
 0x191   :  { %v110_v31 = vadd.f32 %v169_v29, %v109_v30 }
 0x193   :  { %112 = vxpose.xlu0.b32.start.end [1/1] (short) (narrow) %v110_v31, 8 }
 0x237   :  { %v128_v32 = vpop.trf.xlu0 }
 0x238   :  { %145 = vst.msk [vmem:[#allocation2] sm:$0x3] %vm144_vm2, %v128_v32 }
 0x239   :  { %156 = dma.vmem_to_hbm [thread:$0]  %s152_s29, 32, %s154_s3, [#allocation3]  }
 0x23a   :  { %194 = dma.done.wait [#allocation3], 32  }
 0x23b   :  { %195 = vsyncadd [#allocation3], 4294967264 }
 0x23c   :  { %161 = vsyncpa [#allocation3], 1 }

</bundles_post_ra>
